<compile_context>
chip_gen: v6e
topology: v6e:2x2x1
jax: 0.10.0
libtpu: 0.0.40
codegen_flags: <defaults>
</compile_context>

<pallas_src>
import jax
import jax.numpy as jnp
from jax.experimental import pallas as pl
from jax.experimental.pallas import tpu as pltpu

# ----------------------------- small synthetic config -----------------------------
B = 2          # batch
C_IN = 8       # in_channels
C_OUT = 8      # out_channels (== in_channels, required by the module itself)
C_SKIP = 8     # skip_channels
N_NODES = 8    # graph nodes
T = 16         # time steps
KT = 2         # graph diffusion order (gcn kt)
S_LEN = 2      # supports_len
K = 3          # temporal kernel_size
DIL = 1        # dilation
NH = 64        # controller hidden size
T_OUT = T - (K - 1) * DIL            # 14
R = T_OUT * N_NODES                  # 112  per-batch columns, ordered (t, n) t-major
BR = B * R                           # 224  batch-folded lane axis inside the kernel
KC = K * C_IN                        # 24   im2col rows
WCAT_ROWS = C_SKIP + (KT + 1) * C_IN # 32   stacked [skip_w ; wst_0..wst_KT]
Q = (N_NODES * T_OUT) // C_OUT       # 14   rows-per-channel of the raw reinterpreted view
BN_EPS = 1e-5

# The module wiring (skip_conv on the gelu output, gcn channel counts, the raw
# reshape(b, k, n, t) inside gcn) and the bigm/res packing below rely on these.
assert C_OUT == C_IN == C_SKIP
assert (N_NODES * T_OUT) % C_OUT == 0


# ----------------------------- in-kernel helpers -----------------------------
def _erf(z):
    # Abramowitz & Stegun 7.1.26, max abs error ~1.5e-7; avoids relying on an erf
    # primitive lowering inside Mosaic.
    p = 0.3275911
    a1, a2, a3, a4, a5 = 0.254829592, -0.284496736, 1.421413741, -1.453152027, 1.061405429
    sgn = jnp.where(z >= 0.0, 1.0, -1.0)
    az = jnp.abs(z)
    t = 1.0 / (1.0 + p * az)
    poly = ((((a5 * t + a4) * t + a3) * t + a2) * t + a1) * t
    return sgn * (1.0 - poly * jnp.exp(-az * az))


def _gelu(z):
    # exact (erf-based) GELU, matching torch.nn.functional.gelu default
    return 0.5 * z * (1.0 + _erf(z * 0.7071067811865476))


# ----------------------------- fused kernel (single grid step, all batches) ------------
def fused_kernel(xcolT_ref, wconvT_ref, wcatT_ref, vpackT_ref, rowT_ref,
                 skipinT_ref, apowT_ref, bigmT_ref, resT_ref, outT_ref):
    vp = vpackT_ref[...]                                   # (C_OUT, 3) f32: [bias | f | skip_b]
    rp = rowT_ref[...]                                     # (KT+3, BR) f32: te_0..te_KT | bn_scale | bn_add

    # ---- dilated (1,K) temporal conv as one im2col matmul + bias + GELU(f * conv)
    y = jnp.dot(wconvT_ref[...], xcolT_ref[...],
                preferred_element_type=jnp.float32) + vp[:, 0:1]        # (C_OUT, BR)
    act = _gelu(vp[:, 1:2] * y)                                          # f32
    act_b = act.astype(jnp.bfloat16)

    # ---- one wide matmul for the 1x1 skip conv AND all gcn  x @ wst_i  products
    zcat = jnp.dot(wcatT_ref[...], act_b,
                   preferred_element_type=jnp.float32)                  # (32, BR)

    # skip path (rows 0:C_SKIP) + skip bias + incoming skip
    skipT = zcat[0:C_SKIP, :] + vp[:, 2:3] + skipinT_ref[...]

    # ---- gcn diffusion, power-sum refolded; per-batch time_emb is a per-column scale.
    base = C_SKIP
    gsumT = float(S_LEN) * (rp[KT:KT + 1, :]
                            * zcat[base + KT * C_IN:base + (KT + 1) * C_IN, :])
    for i in range(KT):
        xw_i = rp[i:i + 1, :] * zcat[base + i * C_IN:base + (i + 1) * C_IN, :]
        gsumT = gsumT + jnp.dot(xw_i.astype(jnp.bfloat16), apowT_ref[i],
                                preferred_element_type=jnp.float32)     # (C_IN, BR)

    # ---- 1x1 mlp + residual + eval BatchNorm.  torch's raw reshape(b,k,n,t)
    #      reinterpretation + BN scale are pre-folded into bigm; shift/scale are
    #      per-column vectors.  Result columns are already in raw (c, n, t) order.
    outT = (jnp.dot(gsumT.astype(jnp.bfloat16), bigmT_ref[...],
                    preferred_element_type=jnp.float32)
            + resT_ref[...] * rp[KT + 1:KT + 2, :] + rp[KT + 2:KT + 3, :])

    outT_ref[0:C_OUT, :] = outT
    outT_ref[C_OUT:C_OUT + C_SKIP, :] = skipT


# ----------------------------- parameters -----------------------------
def init_params(key):
    ks = jax.random.split(key, 16)
    r = C_OUT // C_IN
    p = {
        'conv_w':   0.1 * jax.random.normal(ks[0], (C_OUT, C_IN, 1, K), jnp.float32),
        'conv_bias': jnp.zeros((C_OUT,), jnp.float32),          # nn.Parameter(zeros)
        'ctrl_w':   0.1 * jax.random.normal(ks[1], (NH, C_OUT * K), jnp.float32),
        'ctrl_b':   0.1 * jax.random.normal(ks[2], (NH,), jnp.float32),
        'calw_w':   0.1 * jax.random.normal(ks[3], (K, NH), jnp.float32),
        'calw_b':   0.1 * jax.random.normal(ks[4], (K,), jnp.float32),
        'calb_w':   0.1 * jax.random.normal(ks[5], (r, NH), jnp.float32),
        'calb_b':   0.1 * jax.random.normal(ks[6], (r,), jnp.float32),
        'calf_w':   0.1 * jax.random.normal(ks[7], (r, NH), jnp.float32),
        'calf_b':   0.1 * jax.random.normal(ks[8], (r,), jnp.float32),
        'skip_w':   0.1 * jax.random.normal(ks[9], (C_SKIP, C_IN, 1, 1), jnp.float32),
        'skip_b':   0.1 * jax.random.normal(ks[10], (C_SKIP,), jnp.float32),
        'w_stack':  0.1 * jax.random.normal(ks[11], (KT + 1, C_OUT, C_IN), jnp.float32),
        'mlp_w':    0.1 * jax.random.normal(ks[12], (C_IN, C_OUT, 1, 1), jnp.float32),
        'mlp_b':    0.1 * jax.random.normal(ks[13], (C_IN,), jnp.float32),
        'bn_gamma': jnp.ones((C_IN,), jnp.float32),
        'bn_beta':  jnp.zeros((C_IN,), jnp.float32),
        'bn_mean':  jnp.zeros((C_IN,), jnp.float32),
        'bn_var':   jnp.ones((C_IN,), jnp.float32),
        'grads':    jnp.zeros((C_OUT * C_IN * K,), jnp.float32),  # conv.weight.numel(), init 0
    }
    return p


# ----------------------------- full forward -----------------------------
def same_pad_conv_forward(x, skip, supports, time_emb, p):
    Bb, Ci, Nn, Tt = x.shape
    Tp = Tt - (K - 1) * DIL
    Rr = Tp * Nn
    BRr = Bb * Rr
    q = (Nn * Tp) // C_OUT

    # graphcof(): self.cof has shape (1, kt+1) != time_emb's (B, kt+1) here -> identity.
    # TODO(synk): graphcof's stateful GW/cof memory rewrite and fw_chunks' trigger
    # branch / q_ema / store_grad EMA are cross-call state updates not exercised on
    # this first eval-mode forward (trigger == 0); omitted.
    te = time_emb

    # ---- fw_chunks(): tiny controller MLP on the zero grads buffer (plain XLA glue)
    xg = p['grads'].reshape(C_IN, C_OUT * K)
    rep = jax.nn.silu(xg @ p['ctrl_w'].T + p['ctrl_b'])
    w_cal = rep @ p['calw_w'].T + p['calw_b']          # (Cin, K)
    b_cal = rep @ p['calb_w'].T + p['calb_b']          # (Cin, Cout//Cin)
    f_cal = rep @ p['calf_w'].T + p['calf_b']          # (Cin, Cout//Cin)
    cw = p['conv_w'] * w_cal[None, :, None, :]         # calibrated conv weight
    eff_bias = p['conv_bias'] * b_cal.reshape(-1)      # calibrated conv bias (zeros here)
    f_vec = f_cal.reshape(-1)

    # ---- transposed operand packing (all tiny, trace-time XLA)
    wconvT = cw[:, :, 0, :].transpose(0, 2, 1).reshape(C_OUT, K * Ci)       # (Cout, K*Cin)
    skw = p['skip_w'][:, :, 0, 0]                                            # (Cskip, Cin)
    fn = jnp.sqrt(jnp.sum(p['w_stack'] ** 2, axis=(1, 2))) / jnp.sqrt(C_IN)
    wst = p['w_stack'] / fn[:, None, None]                                   # (kt+1, Cout, Cin)
    wcatT = jnp.concatenate([skw] + [wst[i].T for i in range(KT + 1)], axis=0)  # (32, Cout)
    vpackT = jnp.stack([eff_bias, f_vec, p['skip_b']], axis=1)               # (Cout, 3)

    # im2col: rows (k, c), columns (b, t, n) -- batch folded into the lane axis
    xt = jnp.transpose(x, (0, 3, 2, 1))                                      # (B, T, N, Cin)
    xcol = jnp.concatenate([xt[:, k * DIL:k * DIL + Tp] for k in range(K)],
                           axis=-1).reshape(BRr, K * Ci)
    xcolT = xcol.T                                                           # (K*Cin, BR)

    skipinT = jnp.transpose(skip[:, :, :, Tt - Tp:], (1, 0, 3, 2)).reshape(C_SKIP, BRr)

    # per-column scalars: te (gcn (t,n) column space) + BN scale/shift (raw column space)
    te_cols = jnp.repeat(te, Rr, axis=0).T                                   # (kt+1, BR)
    bn_scale = p['bn_gamma'] * jax.lax.rsqrt(p['bn_var'] + BN_EPS)
    bn_shift = p['bn_beta'] - p['bn_mean'] * bn_scale
    mw = p['mlp_w'][:, :, 0, 0]                                              # (Cin, Cout)
    scale_cols = jnp.tile(jnp.repeat(bn_scale, q), Bb)[None, :]              # (1, BR)
    add_cols = jnp.tile(jnp.repeat(bn_scale * p['mlp_b'] + bn_shift, q), Bb)[None, :]
    rowT = jnp.concatenate([te_cols, scale_cols, add_cols], axis=0)          # (kt+3, BR)

    # diffusion power sums, block-diagonal over all (b, t) blocks (same A everywhere).
    # TODO(synk): the kron materialization scales as (B*N*T_OUT)^2 and is the first
    # thing to blow v7x's 64 MiB VMEM at larger N/T; replace with per-(b,t)-block
    # dot_general (or a node-tiled grid) before scaling up.
    eye_bt = jnp.eye(Bb * Tp, dtype=jnp.float32)
    pows = []
    for j in range(KT, 0, -1):                       # exponents KT .. 1
        m = None
        for a in supports:
            aj = a
            for _ in range(j - 1):
                aj = aj @ a
            m = aj if m is None else m + aj
        pows.append(jnp.kron(eye_bt, m.T))           # transposed right-operand
    apowT = jnp.stack(pows, axis=0).astype(jnp.bfloat16)                     # (KT, BR, BR)

    # 1x1 mlp + torch's raw reshape(b,k,n,t) reinterpretation + eval BN, folded into one
    # right-operand matrix (per batch: bn_scale-rows * kron(mlp_w, I_q), block-diag over B)
    bigm_b = jnp.repeat(bn_scale, q)[:, None] * jnp.kron(mw, jnp.eye(q, dtype=jnp.float32))
    bigmT = jnp.kron(jnp.eye(Bb, dtype=jnp.float32), bigm_b).T.astype(jnp.bfloat16)  # (BR, BR)

    # residual, viewed through the same raw (c, n, t) reinterpretation, transposed
    resT = x[:, :, :, Tt - Tp:].reshape(BRr, C_OUT).T                        # (Cout, BR)

    fused = pl.pallas_call(
        fused_kernel,
        out_shape=jax.ShapeDtypeStruct((C_OUT + C_SKIP, BRr), jnp.float32),
        grid=(1,),
        in_specs=[
            pl.BlockSpec((K * Ci, BRr), lambda i: (0, 0)),          # xcolT   (bf16)
            pl.BlockSpec((C_OUT, K * Ci), lambda i: (0, 0)),        # wconvT  (bf16)
            pl.BlockSpec((WCAT_ROWS, C_OUT), lambda i: (0, 0)),     # wcatT   (bf16)
            pl.BlockSpec((C_OUT, 3), lambda i: (0, 0)),             # vpackT  (f32)
            pl.BlockSpec((KT + 3, BRr), lambda i: (0, 0)),          # rowT    (f32)
            pl.BlockSpec((C_SKIP, BRr), lambda i: (0, 0)),          # skipinT (f32)
            pl.BlockSpec((KT, BRr, BRr), lambda i: (0, 0, 0)),      # apowT   (bf16)
            pl.BlockSpec((BRr, BRr), lambda i: (0, 0)),             # bigmT   (bf16)
            pl.BlockSpec((C_OUT, BRr), lambda i: (0, 0)),           # resT    (f32)
        ],
        out_specs=pl.BlockSpec((C_OUT + C_SKIP, BRr), lambda i: (0, 0)),
        compiler_params=pltpu.CompilerParams(dimension_semantics=("arbitrary",)),
    )(xcolT.astype(jnp.bfloat16), wconvT.astype(jnp.bfloat16),
      wcatT.astype(jnp.bfloat16), vpackT, rowT, skipinT, apowT, bigmT, resT)

    # rows 0:C_OUT already hold the raw (c, n, t) ordered result per batch
    out = fused[:C_OUT, :].T.reshape(Bb, Ci, Nn, Tp)
    skip_out = jnp.transpose(fused[C_OUT:, :].reshape(C_SKIP, Bb, Tp, Nn), (1, 0, 3, 2))
    return out, skip_out


# ----------------------------- pure-JAX reference (torch-mirroring) -----------------------------
def reference_forward(x, skip, supports, time_emb, p):
    Bb, Ci, Nn, Tt = x.shape
    Tp = Tt - (K - 1) * DIL
    te = time_emb

    xg = p['grads'].reshape(C_IN, C_OUT * K)
    rep = jax.nn.silu(xg @ p['ctrl_w'].T + p['ctrl_b'])
    w_cal = rep @ p['calw_w'].T + p['calw_b']
    b_cal = rep @ p['calb_w'].T + p['calb_b']
    f_cal = rep @ p['calf_w'].T + p['calf_b']
    cw = p['conv_w'] * w_cal[None, :, None, :]
    eff_bias = p['conv_bias'] * b_cal.reshape(-1)
    f_vec = f_cal.reshape(-1)

    conv = jnp.zeros((Bb, C_OUT, Nn, Tp), jnp.float32)
    for k in range(K):
        conv = conv + jnp.einsum('oc,bcnt->bont', cw[:, :, 0, k],
                                 x[:, :, :, k * DIL:k * DIL + Tp])
    conv = conv + eff_bias[None, :, None, None]
    act = jax.nn.gelu(f_vec[None, :, None, None] * conv, approximate=False)

    skw = p['skip_w'][:, :, 0, 0]
    s = jnp.einsum('sc,bcnt->bsnt', skw, act) + p['skip_b'][None, :, None, None]
    skip_out = s + skip[:, :, :, Tt - Tp:]

    fn = jnp.sqrt(jnp.sum(p['w_stack'] ** 2, axis=(1, 2))) / jnp.sqrt(C_IN)
    wst = p['w_stack'] / fn[:, None, None]
    xp = jnp.transpose(act, (0, 2, 3, 1))                 # (B, N, T, C)
    outs = []
    for a in supports:
        z = jnp.einsum('bntc,cd->bntd', xp, wst[0]) * te[:, 0][:, None, None, None]
        z = jnp.transpose(z, (0, 2, 1, 3)).reshape(Bb * Tp, Nn, -1)
        for i in range(1, KT + 1):
            xi = jnp.einsum('bntc,cd->bntd', xp, wst[i]) * te[:, i][:, None, None, None]
            xi = jnp.transpose(xi, (0, 2, 1, 3)).reshape(Bb * Tp, Nn, -1)
            z = jnp.einsum('vw,pwc->pvc', a, z) + xi
        outs.append(z)
    h = sum(outs).reshape(Bb, C_OUT, Nn, Tp)              # raw row-major reinterpretation
    mw = p['mlp_w'][:, :, 0, 0]
    h = jnp.einsum('oc,bcnt->bont', mw, h) + p['mlp_b'][None, :, None, None]
    xres = h + x[:, :, :, Tt - Tp:]
    scale = p['bn_gamma'] * jax.lax.rsqrt(p['bn_var'] + BN_EPS)
    shift = p['bn_beta'] - p['bn_mean'] * scale
    out = xres * scale[None, :, None, None] + shift[None, :, None, None]
    return out, skip_out


# ----------------------------- main -----------------------------
if __name__ == "__main__":
    key = jax.random.PRNGKey(0)
    kp, kx, ksk, ka, kte = jax.random.split(key, 5)
    params = init_params(kp)

    x = jax.random.normal(kx, (B, C_IN, N_NODES, T), jnp.float32)
    skip = jax.random.normal(ksk, (B, C_SKIP, N_NODES, T), jnp.float32)
    sup_keys = jax.random.split(ka, S_LEN)
    supports = [jax.nn.softmax(jax.random.normal(k, (N_NODES, N_NODES), jnp.float32), axis=-1)
                for k in sup_keys]
    time_emb = jax.random.normal(kte, (B, KT + 1), jnp.float32)

    fwd = jax.jit(same_pad_conv_forward)
    out, skip_out = fwd(x, skip, supports, time_emb, params)
    jax.block_until_ready((out, skip_out))

    assert out.shape == (B, C_IN, N_NODES, T_OUT), out.shape
    assert skip_out.shape == (B, C_SKIP, N_NODES, T_OUT), skip_out.shape
    assert bool(jnp.all(jnp.isfinite(out))) and bool(jnp.all(jnp.isfinite(skip_out)))

    # correctness guard: pure-JAX torch-mirroring reference.  Tolerance is sized for the
    # bf16 MXU operands (the outputs are residual/skip-dominated, so the real error is
    # far below this, while layout bugs would produce O(1) mismatches and still fail).
    ref_out, ref_skip = jax.jit(reference_forward)(x, skip, supports, time_emb, params)
    assert bool(jnp.allclose(out, ref_out, rtol=2e-2, atol=2e-2)), \
        float(jnp.max(jnp.abs(out - ref_out)))
    assert bool(jnp.allclose(skip_out, ref_skip, rtol=2e-2, atol=2e-2)), \
        float(jnp.max(jnp.abs(skip_out - ref_skip)))

    print("KERNEL_OK")
</pallas_src>

<mosaic_0001>
module attributes {stable_mosaic.version = 11 : i64} {
  func.func @fused_kernel(%arg0: i32, %arg1: memref<24x224xbf16, #tpu.memory_space<vmem>>, %arg2: memref<8x24xbf16, #tpu.memory_space<vmem>>, %arg3: memref<32x8xbf16, #tpu.memory_space<vmem>>, %arg4: memref<8x3xf32, #tpu.memory_space<vmem>>, %arg5: memref<5x224xf32, #tpu.memory_space<vmem>>, %arg6: memref<8x224xf32, #tpu.memory_space<vmem>>, %arg7: memref<2x224x224xbf16, #tpu.memory_space<vmem>>, %arg8: memref<224x224xbf16, #tpu.memory_space<vmem>>, %arg9: memref<8x224xf32, #tpu.memory_space<vmem>>, %arg10: memref<16x224xf32, #tpu.memory_space<vmem>>) attributes {dimension_semantics = [#tpu.dimension_semantics<arbitrary>], iteration_bounds = array<i64: 1>, scalar_prefetch = 0 : i64, scratch_operands = 0 : i64, tpu.core_type = #tpu.core_type<tc>, window_params = [{pipeline_mode = #tpu.pipeline_mode<synchronous>, transform_indices = @transform_0, window_bounds = array<i64: 24, 224>}, {pipeline_mode = #tpu.pipeline_mode<synchronous>, transform_indices = @transform_1, window_bounds = array<i64: 8, 24>}, {pipeline_mode = #tpu.pipeline_mode<synchronous>, transform_indices = @transform_2, window_bounds = array<i64: 32, 8>}, {pipeline_mode = #tpu.pipeline_mode<synchronous>, transform_indices = @transform_3, window_bounds = array<i64: 8, 3>}, {pipeline_mode = #tpu.pipeline_mode<synchronous>, transform_indices = @transform_4, window_bounds = array<i64: 5, 224>}, {pipeline_mode = #tpu.pipeline_mode<synchronous>, transform_indices = @transform_5, window_bounds = array<i64: 8, 224>}, {pipeline_mode = #tpu.pipeline_mode<synchronous>, transform_indices = @transform_6, window_bounds = array<i64: 2, 224, 224>}, {pipeline_mode = #tpu.pipeline_mode<synchronous>, transform_indices = @transform_7, window_bounds = array<i64: 224, 224>}, {pipeline_mode = #tpu.pipeline_mode<synchronous>, transform_indices = @transform_8, window_bounds = array<i64: 8, 224>}, {pipeline_mode = #tpu.pipeline_mode<synchronous>, transform_indices = @transform_9, window_bounds = array<i64: 16, 224>}]} {
    %c0 = arith.constant 0 : index
    %c0_0 = arith.constant 0 : index
    %0 = vector.load %arg4[%c0, %c0_0] : memref<8x3xf32, #tpu.memory_space<vmem>>, vector<8x3xf32>
    %c0_1 = arith.constant 0 : index
    %c0_2 = arith.constant 0 : index
    %1 = vector.load %arg5[%c0_1, %c0_2] : memref<5x224xf32, #tpu.memory_space<vmem>>, vector<5x224xf32>
    %c0_3 = arith.constant 0 : index
    %c0_4 = arith.constant 0 : index
    %2 = vector.load %arg2[%c0_3, %c0_4] : memref<8x24xbf16, #tpu.memory_space<vmem>>, vector<8x24xbf16>
    %c0_5 = arith.constant 0 : index
    %c0_6 = arith.constant 0 : index
    %3 = vector.load %arg1[%c0_5, %c0_6] : memref<24x224xbf16, #tpu.memory_space<vmem>>, vector<24x224xbf16>
    %cst = arith.constant dense<0.000000e+00> : vector<8x224xf32>
    %4 = tpu.matmul %2, %3, %cst {dimension_numbers = #tpu.dot_dimension_numbers<[1], [0], [0], [1], [0, 0, 1, 1], [], []>} : vector<8x24xbf16>, vector<24x224xbf16>, vector<8x224xf32> -> vector<8x224xf32>
    %5 = vector.extract_strided_slice %0 {offsets = [0, 0], sizes = [8, 1], strides = [1, 1]} : vector<8x3xf32> to vector<8x1xf32>
    %6 = vector.broadcast %5 : vector<8x1xf32> to vector<8x224xf32>
    %7 = arith.addf %4, %6 : vector<8x224xf32>
    %8 = vector.extract_strided_slice %0 {offsets = [0, 1], sizes = [8, 1], strides = [1, 1]} : vector<8x3xf32> to vector<8x1xf32>
    %9 = vector.broadcast %8 : vector<8x1xf32> to vector<8x224xf32>
    %10 = arith.mulf %9, %7 : vector<8x224xf32>
    %cst_7 = arith.constant 5.000000e-01 : f32
    %11 = vector.broadcast %cst_7 : f32 to vector<8x224xf32>
    %12 = arith.mulf %11, %10 : vector<8x224xf32>
    %cst_8 = arith.constant 0.707106769 : f32
    %13 = vector.broadcast %cst_8 : f32 to vector<8x224xf32>
    %14 = arith.mulf %10, %13 : vector<8x224xf32>
    %cst_9 = arith.constant 0.000000e+00 : f32
    %15 = vector.broadcast %cst_9 : f32 to vector<8x224xf32>
    %16 = arith.cmpf oge, %14, %15 : vector<8x224xf32>
    %cst_10 = arith.constant 1.000000e+00 : f32
    %cst_11 = arith.constant -1.000000e+00 : f32
    %17 = vector.broadcast %cst_10 : f32 to vector<8x224xf32>
    %18 = vector.broadcast %cst_11 : f32 to vector<8x224xf32>
    %19 = arith.select %16, %17, %18 : vector<8x224xi1>, vector<8x224xf32>
    %20 = math.absf %14 : vector<8x224xf32>
    %cst_12 = arith.constant 0.327591091 : f32
    %21 = vector.broadcast %cst_12 : f32 to vector<8x224xf32>
    %22 = arith.mulf %21, %20 : vector<8x224xf32>
    %cst_13 = arith.constant 1.000000e+00 : f32
    %23 = vector.broadcast %cst_13 : f32 to vector<8x224xf32>
    %24 = arith.addf %23, %22 : vector<8x224xf32>
    %cst_14 = arith.constant 1.000000e+00 : f32
    %25 = vector.broadcast %cst_14 : f32 to vector<8x224xf32>
    %26 = arith.divf %25, %24 : vector<8x224xf32>
    %cst_15 = arith.constant 1.06140542 : f32
    %27 = vector.broadcast %cst_15 : f32 to vector<8x224xf32>
    %28 = arith.mulf %27, %26 : vector<8x224xf32>
    %cst_16 = arith.constant -1.45315206 : f32
    %29 = vector.broadcast %cst_16 : f32 to vector<8x224xf32>
    %30 = arith.addf %28, %29 : vector<8x224xf32>
    %31 = arith.mulf %30, %26 : vector<8x224xf32>
    %cst_17 = arith.constant 1.42141378 : f32
    %32 = vector.broadcast %cst_17 : f32 to vector<8x224xf32>
    %33 = arith.addf %31, %32 : vector<8x224xf32>
    %34 = arith.mulf %33, %26 : vector<8x224xf32>
    %cst_18 = arith.constant -0.284496725 : f32
    %35 = vector.broadcast %cst_18 : f32 to vector<8x224xf32>
    %36 = arith.addf %34, %35 : vector<8x224xf32>
    %37 = arith.mulf %36, %26 : vector<8x224xf32>
    %cst_19 = arith.constant 0.254829586 : f32
    %38 = vector.broadcast %cst_19 : f32 to vector<8x224xf32>
    %39 = arith.addf %37, %38 : vector<8x224xf32>
    %40 = arith.mulf %39, %26 : vector<8x224xf32>
    %cst_20 = arith.constant 0.000000e+00 : f32
    %41 = vector.broadcast %cst_20 : f32 to vector<8x224xf32>
    %42 = arith.subf %41, %20 : vector<8x224xf32>
    %43 = arith.mulf %42, %20 : vector<8x224xf32>
    %44 = math.exp %43 : vector<8x224xf32>
    %45 = arith.mulf %40, %44 : vector<8x224xf32>
    %cst_21 = arith.constant 1.000000e+00 : f32
    %46 = vector.broadcast %cst_21 : f32 to vector<8x224xf32>
    %47 = arith.subf %46, %45 : vector<8x224xf32>
    %48 = arith.mulf %19, %47 : vector<8x224xf32>
    %cst_22 = arith.constant 1.000000e+00 : f32
    %49 = vector.broadcast %cst_22 : f32 to vector<8x224xf32>
    %50 = arith.addf %49, %48 : vector<8x224xf32>
    %51 = arith.mulf %12, %50 : vector<8x224xf32>
    %52 = arith.truncf %51 : vector<8x224xf32> to vector<8x224xbf16>
    %c0_23 = arith.constant 0 : index
    %c0_24 = arith.constant 0 : index
    %53 = vector.load %arg3[%c0_23, %c0_24] : memref<32x8xbf16, #tpu.memory_space<vmem>>, vector<32x8xbf16>
    %cst_25 = arith.constant dense<0.000000e+00> : vector<32x224xf32>
    %54 = tpu.matmul %53, %52, %cst_25 {dimension_numbers = #tpu.dot_dimension_numbers<[1], [0], [0], [1], [0, 0, 1, 1], [], []>} : vector<32x8xbf16>, vector<8x224xbf16>, vector<32x224xf32> -> vector<32x224xf32>
    %55 = vector.extract_strided_slice %54 {offsets = [0, 0], sizes = [8, 224], strides = [1, 1]} : vector<32x224xf32> to vector<8x224xf32>
    %56 = vector.extract_strided_slice %0 {offsets = [0, 2], sizes = [8, 1], strides = [1, 1]} : vector<8x3xf32> to vector<8x1xf32>
    %57 = vector.broadcast %56 : vector<8x1xf32> to vector<8x224xf32>
    %58 = arith.addf %55, %57 : vector<8x224xf32>
    %c0_26 = arith.constant 0 : index
    %c0_27 = arith.constant 0 : index
    %59 = vector.load %arg6[%c0_26, %c0_27] : memref<8x224xf32, #tpu.memory_space<vmem>>, vector<8x224xf32>
    %60 = arith.addf %58, %59 : vector<8x224xf32>
    %61 = vector.extract_strided_slice %1 {offsets = [2, 0], sizes = [1, 224], strides = [1, 1]} : vector<5x224xf32> to vector<1x224xf32>
    %62 = vector.extract_strided_slice %54 {offsets = [24, 0], sizes = [8, 224], strides = [1, 1]} : vector<32x224xf32> to vector<8x224xf32>
    %63 = vector.broadcast %61 : vector<1x224xf32> to vector<8x224xf32>
    %64 = arith.mulf %63, %62 : vector<8x224xf32>
    %cst_28 = arith.constant 2.000000e+00 : f32
    %65 = vector.broadcast %cst_28 : f32 to vector<8x224xf32>
    %66 = arith.mulf %65, %64 : vector<8x224xf32>
    %67 = vector.extract_strided_slice %1 {offsets = [0, 0], sizes = [1, 224], strides = [1, 1]} : vector<5x224xf32> to vector<1x224xf32>
    %68 = vector.extract_strided_slice %54 {offsets = [8, 0], sizes = [8, 224], strides = [1, 1]} : vector<32x224xf32> to vector<8x224xf32>
    %69 = vector.broadcast %67 : vector<1x224xf32> to vector<8x224xf32>
    %70 = arith.mulf %69, %68 : vector<8x224xf32>
    %71 = arith.truncf %70 : vector<8x224xf32> to vector<8x224xbf16>
    %c0_29 = arith.constant 0 : index
    %c0_30 = arith.constant 0 : index
    %c0_31 = arith.constant 0 : index
    %72 = vector.load %arg7[%c0_29, %c0_30, %c0_31] : memref<2x224x224xbf16, #tpu.memory_space<vmem>>, vector<1x224x224xbf16>
    %73 = vector.shape_cast %72 : vector<1x224x224xbf16> to vector<224x224xbf16>
    %cst_32 = arith.constant dense<0.000000e+00> : vector<8x224xf32>
    %74 = tpu.matmul %71, %73, %cst_32 {dimension_numbers = #tpu.dot_dimension_numbers<[1], [0], [0], [1], [0, 0, 1, 1], [], []>} : vector<8x224xbf16>, vector<224x224xbf16>, vector<8x224xf32> -> vector<8x224xf32>
    %75 = arith.addf %66, %74 : vector<8x224xf32>
    %76 = vector.extract_strided_slice %1 {offsets = [1, 0], sizes = [1, 224], strides = [1, 1]} : vector<5x224xf32> to vector<1x224xf32>
    %77 = vector.extract_strided_slice %54 {offsets = [16, 0], sizes = [8, 224], strides = [1, 1]} : vector<32x224xf32> to vector<8x224xf32>
    %78 = vector.broadcast %76 : vector<1x224xf32> to vector<8x224xf32>
    %79 = arith.mulf %78, %77 : vector<8x224xf32>
    %80 = arith.truncf %79 : vector<8x224xf32> to vector<8x224xbf16>
    %c1 = arith.constant 1 : index
    %c0_33 = arith.constant 0 : index
    %c0_34 = arith.constant 0 : index
    %81 = vector.load %arg7[%c1, %c0_33, %c0_34] : memref<2x224x224xbf16, #tpu.memory_space<vmem>>, vector<1x224x224xbf16>
    %82 = vector.shape_cast %81 : vector<1x224x224xbf16> to vector<224x224xbf16>
    %cst_35 = arith.constant dense<0.000000e+00> : vector<8x224xf32>
    %83 = tpu.matmul %80, %82, %cst_35 {dimension_numbers = #tpu.dot_dimension_numbers<[1], [0], [0], [1], [0, 0, 1, 1], [], []>} : vector<8x224xbf16>, vector<224x224xbf16>, vector<8x224xf32> -> vector<8x224xf32>
    %84 = arith.addf %75, %83 : vector<8x224xf32>
    %85 = arith.truncf %84 : vector<8x224xf32> to vector<8x224xbf16>
    %c0_36 = arith.constant 0 : index
    %c0_37 = arith.constant 0 : index
    %86 = vector.load %arg8[%c0_36, %c0_37] : memref<224x224xbf16, #tpu.memory_space<vmem>>, vector<224x224xbf16>
    %cst_38 = arith.constant dense<0.000000e+00> : vector<8x224xf32>
    %87 = tpu.matmul %85, %86, %cst_38 {dimension_numbers = #tpu.dot_dimension_numbers<[1], [0], [0], [1], [0, 0, 1, 1], [], []>} : vector<8x224xbf16>, vector<224x224xbf16>, vector<8x224xf32> -> vector<8x224xf32>
    %c0_39 = arith.constant 0 : index
    %c0_40 = arith.constant 0 : index
    %88 = vector.load %arg9[%c0_39, %c0_40] : memref<8x224xf32, #tpu.memory_space<vmem>>, vector<8x224xf32>
    %89 = vector.extract_strided_slice %1 {offsets = [3, 0], sizes = [1, 224], strides = [1, 1]} : vector<5x224xf32> to vector<1x224xf32>
    %90 = vector.broadcast %89 : vector<1x224xf32> to vector<8x224xf32>
    %91 = arith.mulf %88, %90 : vector<8x224xf32>
    %92 = arith.addf %87, %91 : vector<8x224xf32>
    %93 = vector.extract_strided_slice %1 {offsets = [4, 0], sizes = [1, 224], strides = [1, 1]} : vector<5x224xf32> to vector<1x224xf32>
    %94 = vector.broadcast %93 : vector<1x224xf32> to vector<8x224xf32>
    %95 = arith.addf %92, %94 : vector<8x224xf32>
    %c0_41 = arith.constant 0 : index
    %c0_42 = arith.constant 0 : index
    %96 = vector.load %arg10[%c0_41, %c0_42] : memref<16x224xf32, #tpu.memory_space<vmem>>, vector<8x224xf32>
    tpu.vector_store %arg10[%c0_41, %c0_42], %95 {strides = array<i32>} : memref<16x224xf32, #tpu.memory_space<vmem>>, vector<8x224xf32>,
    %c8 = arith.constant 8 : index
    %c0_43 = arith.constant 0 : index
    %97 = vector.load %arg10[%c8, %c0_43] : memref<16x224xf32, #tpu.memory_space<vmem>>, vector<8x224xf32>
    tpu.vector_store %arg10[%c8, %c0_43], %60 {strides = array<i32>} : memref<16x224xf32, #tpu.memory_space<vmem>>, vector<8x224xf32>,
    return
  }
  func.func @transform_0(%arg0: i32) -> (i32, i32) {
    %c0_i32 = arith.constant 0 : i32
    %c0_i32_0 = arith.constant 0 : i32
    %c0_i32_1 = arith.constant 0 : i32
    return %c0_i32, %c0_i32_0 : i32, i32
  }
  func.func @transform_1(%arg0: i32) -> (i32, i32) {
    %c0_i32 = arith.constant 0 : i32
    %c0_i32_0 = arith.constant 0 : i32
    %c0_i32_1 = arith.constant 0 : i32
    return %c0_i32, %c0_i32_0 : i32, i32
  }
  func.func @transform_2(%arg0: i32) -> (i32, i32) {
    %c0_i32 = arith.constant 0 : i32
    %c0_i32_0 = arith.constant 0 : i32
    %c0_i32_1 = arith.constant 0 : i32
    return %c0_i32, %c0_i32_0 : i32, i32
  }
  func.func @transform_3(%arg0: i32) -> (i32, i32) {
    %c0_i32 = arith.constant 0 : i32
    %c0_i32_0 = arith.constant 0 : i32
    %c0_i32_1 = arith.constant 0 : i32
    return %c0_i32, %c0_i32_0 : i32, i32
  }
  func.func @transform_4(%arg0: i32) -> (i32, i32) {
    %c0_i32 = arith.constant 0 : i32
    %c0_i32_0 = arith.constant 0 : i32
    %c0_i32_1 = arith.constant 0 : i32
    return %c0_i32, %c0_i32_0 : i32, i32
  }
  func.func @transform_5(%arg0: i32) -> (i32, i32) {
    %c0_i32 = arith.constant 0 : i32
    %c0_i32_0 = arith.constant 0 : i32
    %c0_i32_1 = arith.constant 0 : i32
    return %c0_i32, %c0_i32_0 : i32, i32
  }
  func.func @transform_6(%arg0: i32) -> (i32, i32, i32) {
    %c0_i32 = arith.constant 0 : i32
    %c0_i32_0 = arith.constant 0 : i32
    %c0_i32_1 = arith.constant 0 : i32
    %c0_i32_2 = arith.constant 0 : i32
    return %c0_i32, %c0_i32_0, %c0_i32_1 : i32, i32, i32
  }
  func.func @transform_7(%arg0: i32) -> (i32, i32) {
    %c0_i32 = arith.constant 0 : i32
    %c0_i32_0 = arith.constant 0 : i32
    %c0_i32_1 = arith.constant 0 : i32
    return %c0_i32, %c0_i32_0 : i32, i32
  }
  func.func @transform_8(%arg0: i32) -> (i32, i32) {
    %c0_i32 = arith.constant 0 : i32
    %c0_i32_0 = arith.constant 0 : i32
    %c0_i32_1 = arith.constant 0 : i32
    return %c0_i32, %c0_i32_0 : i32, i32
  }
  func.func @transform_9(%arg0: i32) -> (i32, i32) {
    %c0_i32 = arith.constant 0 : i32
    %c0_i32_0 = arith.constant 0 : i32
    %c0_i32_1 = arith.constant 0 : i32
    return %c0_i32, %c0_i32_0 : i32, i32
  }
}

</mosaic_0001>

<bundles_post_ra>
// kernel: tile.10
= control target key start
LH: loop header
LB: loop body
LE: loop exit
PB: predicated region body
PF: predicated region fallthrough
CT: control target
= control target key end

     0   :  { %s22_s0 = inlined_call_operand.vmem [shape: f32[112], index: 0, kind: input, shape index: {}]   ;;  %s23_s1 = inlined_call_operand.vmem [shape: f32[2,112], index: 1, kind: output, shape index: {}]  }
   0x1   :  { %v4_v0 = vld [vmem:[%s22_s0] ss:$0 sm:$0xff] }
   0x2   :  { %5 = vst [vmem:[%s23_s1] sm:$0x3] %v4_v0 }

// kernel: tile.9
= control target key start
LH: loop header
LB: loop body
LE: loop exit
PB: predicated region body
PF: predicated region fallthrough
CT: control target
= control target key end

     0   :  { %s69_s10 = smov 98   ;;  %s70_s11 = smov 70   ;;  %vm3_vm0 = vcmask 113664   ;;  %vm9_vm1 = vcmask 917264   ;;  %vm15_vm2 = vcmask 802464   ;;  %vm21_vm3 = vcmask 687664   ;;  %s113_s0 = inlined_call_operand.vmem [shape: f32[8,14], index: 0, kind: input, shape index: {}]   ;;  %s114_s1 = inlined_call_operand.vmem [shape: f32[112], index: 1, kind: output, shape index: {}]  }
   0x1   :  { %v55_v0 = vld [vmem:[%s113_s0 + $0x7] sm:$0x1]   ;;  %v57_v1 = vld [vmem:[%s113_s0 + $0x5] sm:$0x1]   ;;  %v56_v2 = vld [vmem:[%s113_s0 + $0x6] sm:$0x1]  }
   0x2   :  { %7 = vrot.lane.b32.xlu0 %v55_v0, %s69_s10  ;;  %19 = vrot.lane.b32.xlu1 %v57_v1, %s70_s11  ;;  %v58_v3 = vld [vmem:[%s113_s0 + $0x4] sm:$0x1]   ;;  %v2_v4 = vld [vmem:[%s113_s0] sm:$0x1]   ;;  %s71_s18 = smov 84   ;;  %s72_s19 = smov 56  }
   0x3   :  { %4 = vst.msk [vmem:[#allocation0] sm:$0x1] %vm3_vm0, %v2_v4   ;;  %v59_v5 = vld [vmem:[%s113_s0 + $0x3] sm:$0x1]   ;;  %v60_v6 = vld [vmem:[%s113_s0 + $0x2] sm:$0x1]  }
   0x4   :  { %s73_s24 = smov 42   ;;  %s74_s25 = smov 28   ;;  %v61_v7 = vld [vmem:[%s113_s0 + $0x1] sm:$0x1]   ;;  %vm27_vm4 = vcmask 572864   ;;  %vm33_vm5 = vcmask 458064  }
   0x5   :  { %s75_s0 = smov 14   ;;  %vm39_vm6 = vcmask 343264   ;;  %vm45_vm7 = vcmask 228464  }
   0x6   :  { %13 = vrot.lane.b32.xlu0 %v56_v2, %s71_s18  ;;  %25 = vrot.lane.b32.xlu1 %v58_v3, %s72_s19 }
   0xa   :  { %31 = vrot.lane.b32.xlu0 %v59_v5, %s73_s24  ;;  %37 = vrot.lane.b32.xlu1 %v60_v6, %s74_s25 }
   0xe   :  { %43 = vrot.lane.b32.xlu0 %v61_v7, %s75_s0 }
  0x74   :  { %v8_v8 = vpop.permute.xlu0 %7   ;;  %v20_v9 = vpop.permute.xlu1 %19  }
  0x75   :  { %10 = vst.msk [vmem:[#allocation0] sm:$0x1] %vm9_vm1, %v8_v8  }
  0x78   :  { %v14_v10 = vpop.permute.xlu0 %13   ;;  %v26_v11 = vpop.permute.xlu1 %25  }
  0x79   :  { %16 = vst.msk [vmem:[#allocation0] sm:$0x1] %vm15_vm2, %v14_v10  }
  0x7a   :  { %22 = vst.msk [vmem:[#allocation0] sm:$0x1] %vm21_vm3, %v20_v9  }
  0x7b   :  { %28 = vst.msk [vmem:[#allocation0] sm:$0x1] %vm27_vm4, %v26_v11  }
  0x7c   :  { %v32_v12 = vpop.permute.xlu0 %31   ;;  %v38_v13 = vpop.permute.xlu1 %37  }
  0x7d   :  { %34 = vst.msk [vmem:[#allocation0] sm:$0x1] %vm33_vm5, %v32_v12  }
  0x7e   :  { %40 = vst.msk [vmem:[#allocation0] sm:$0x1] %vm39_vm6, %v38_v13  }
  0x80   :  { %v44_v14 = vpop.permute.xlu0 %43  }
  0x81   :  { %46 = vst.msk [vmem:[#allocation0] sm:$0x1] %vm45_vm7, %v44_v14  }
  0x88   :  { %v51_v15 = vld [vmem:[#allocation0] sm:$0x1] }
  0x89   :  { %54 = vst [vmem:[%s114_s1] sm:$0x1] %v51_v15 }

// kernel: tile.11
= control target key start
LH: loop header
LB: loop body
LE: loop exit
PB: predicated region body
PF: predicated region fallthrough
CT: control target
= control target key end

     0   :  { %vm14_vm0 = vcmask 130048   ;;  %vm8_vm1 = vcmask 916480   ;;  %vm18_vm2 = vcmask 785408   ;;  %vm21_vm3 = vcmask 1048448   ;;  %s59_s0 = inlined_call_operand.vmem [shape: f32[2,112], index: 0, kind: input, shape index: {}]   ;;  %s60_s1 = inlined_call_operand.vmem [shape: f32[1,224], index: 1, kind: output, shape index: {}]  }
   0x1   :  { %v5_v0 = vld [vmem:[%s59_s0] sm:$0x3]  ;;  %s39_s0 = smov 112  }
   0x2   :  { %6 = vst [vmem:[#allocation1] sm:$0x3] %v5_v0 }
   0x9   :  { %v11_v1 = vld [vmem:[#allocation1 + $0x1] sm:$0x1]   ;;  %v7_v3 = vld [vmem:[#allocation1] sm:$0x1]  }
   0xa   :  { %v13_v2 = vld [vmem:[#allocation1 + $0x1] sm:$0x1]   ;;  %9 = vst.msk [vmem:[#allocation0] sm:$0x1] %vm8_vm1, %v7_v3  }
   0xb   :  { %v15_v4 = vsel %vm14_vm0, %v13_v2, %v11_v1 }
   0xc   :  { %16 = vrot.lane.b32.xlu0 %v15_v4, %s39_s0 }
  0x7e   :  { %v17_v5 = vpop.permute.xlu0 %16  }
  0x7f   :  { %20 = vst.msk [vmem:[#allocation0 + $0x8] sm:$0x1] %vm18_vm2, %v17_v5  }
  0x80   :  { %22 = vst.msk [vmem:[#allocation0] sm:$0x1] %vm21_vm3, %v17_v5  }
  0x86   :  { %v32_v7 = vld [vmem:[#allocation0 + $0x8] sm:$0x1] }
  0x87   :  { %v27_v6 = vld [vmem:[#allocation0] sm:$0x1]  ;;  %37 = vst [vmem:[%s60_s1 + $0x1] sm:$0x1] %v32_v7 }
  0x88   :  { %30 = vst [vmem:[%s60_s1] sm:$0x1] %v27_v6 }

// kernel: same_pad_conv_forward.1
= control target key start
LH: loop header
LB: loop body
LE: loop exit
PB: predicated region body
PF: predicated region fallthrough
CT: control target
= control target key end

     0   :  { %vm64_vm0 = vcmask 1043456   ;;  %v1249_v1 = vmov 0   ;;  %v1250_v8 = vmov 1   ;;  %vm60_vm1 = vcmask 195584   ;;  %s1640_s0 = inlined_call_operand.vmem [shape: bf16[24,224], index: 0, kind: input, shape index: {}]   ;;  %s1641_s3 = inlined_call_operand.vmem [shape: f32[8,3], index: 3, kind: input, shape index: {}]   ;;  %s1642_s1 = inlined_call_operand.vmem [shape: bf16[8,24], index: 1, kind: input, shape index: {}]   ;;  %s1643_s2 = inlined_call_operand.vmem [shape: bf16[32,8], index: 2, kind: input, shape index: {}]   ;;  %s1644_s6 = inlined_call_operand.vmem [shape: bf16[2,224,224], index: 6, kind: input, shape index: {}]   ;;  %s1645_s7 = inlined_call_operand.vmem [shape: bf16[224,224], index: 7, kind: input, shape index: {}]   ;;  %s1646_s4 = inlined_call_operand.vmem [shape: f32[5,224], index: 4, kind: input, shape index: {}]   ;;  %s1647_s5 = inlined_call_operand.vmem [shape: f32[8,224], index: 5, kind: input, shape index: {}]   ;;  %s1648_s9 = inlined_call_operand.vmem [shape: f32[16,224], index: 9, kind: output, shape index: {}]   ;;  %s1649_s8 = inlined_call_operand.vmem [shape: f32[8,224], index: 8, kind: input, shape index: {}]  }
   0x1   :  { %v39_v0 = vld [vmem:[%s1640_s0 + $0x10] sm:$0xff]  ;;  %103 = vmatprep.mubr.bf16.mxu0 %v1249_v1  ;;  %1104 = vset.pattern.permute.xlu0 %v1249_v1  ;;  %v1110_v4 = vld [vmem:[%s1640_s0 + $0x4] ss:$8 sps:$4 sm:$0xff]   ;;  %v1112_v7 = vld [vmem:[%s1640_s0] ss:$8 sps:$4 sm:$0xff]   ;;  %v1251_v10 = vmov 2  }
   0x2   :  { %v977_v2 = vcombine.high %v39_v0, %v39_v0  ;;  %v976_v3 = vcombine.low %v39_v0, %v39_v0  ;;  %v33_v5 = vld [vmem:[%s1641_s3] sm:$0xff]  ;;  %1106 = vset.pattern.permute.xlu1 %v1251_v10  ;;  %v1115_v11 = vld [vmem:[%s1644_s6 + $0x74] ss:$8 sps:$4 sm:$0xff]   ;;  %v1117_v12 = vld [vmem:[%s1644_s6 + $0x70] ss:$8 sps:$4 sm:$0xff]   ;;  %vm188_vm4 = vcmask 64512  }
   0x3   :  { %42 = vperm.xlu0 %1104, %v33_v5   ;;  %v36_v9 = vld [vmem:[%s1642_s1] sm:$0xf]  ;;  %255 = vperm.xlu1 %1106, %v33_v5   ;;  %v1118_v13 = vld [vmem:[%s1644_s6 + $0x64] ss:$8 sps:$4 sm:$0xff]   ;;  %v1124_v15 = vld [vmem:[%s1644_s6 + $0x54] ss:$8 sps:$4 sm:$0xff]  }
   0x4   :  { %978 = vmatprep.subr.msk.bf16.mxu0 %vm64_vm0, %v977_v2  ;;  %v66_v6 = vsel %vm64_vm0, %v976_v3, 0  ;;  %460 = vmatprep.subr.bf16.mxu1 %v1115_v11  ;;  %v1123_v14 = vld [vmem:[%s1644_s6 + $0x60] ss:$8 sps:$4 sm:$0xff]   ;;  %v1129_v16 = vld [vmem:[%s1644_s6 + $0x50] ss:$8 sps:$4 sm:$0xff]   ;;  %vm456_vm5 = vcmask 785408  }
   0x5   :  { %84 = vmatpush1.bf16.msra.mxu0 %v66_v6  ;;  %461 = vmatpush1.bf16.msra.mxu1 %v1117_v12  ;;  %v1130_v17 = vld [vmem:[%s1644_s6 + $0x44] ss:$8 sps:$4 sm:$0xff]   ;;  %v1135_v18 = vld [vmem:[%s1644_s6 + $0x40] ss:$8 sps:$4 sm:$0xff]   ;;  %v1136_v19 = vld [vmem:[%s1644_s6 + $0x34] ss:$8 sps:$4 sm:$0xff]  }
   0x6   :  { %85 = vmatprep.subr.bf16.mxu0 %v1110_v4  ;;  %462 = vmatprep.subr.bf16.mxu1 %v1118_v13  ;;  %v1141_v20 = vld [vmem:[%s1644_s6 + $0x30] ss:$8 sps:$4 sm:$0xff]   ;;  %v1142_v21 = vld [vmem:[%s1644_s6 + $0x24] ss:$8 sps:$4 sm:$0xff]   ;;  %v1147_v22 = vld [vmem:[%s1644_s6 + $0x20] ss:$8 sps:$4 sm:$0xff]  }
   0x7   :  { %1105 = vset.pattern.permute.xlu0 %v1250_v8  ;;  %v1148_v23 = vld [vmem:[%s1644_s6 + $0x14] ss:$8 sps:$4 sm:$0xff]   ;;  %v1153_v24 = vld [vmem:[%s1644_s6 + $0x10] ss:$8 sps:$4 sm:$0xff]   ;;  %v1154_v25 = vld [vmem:[%s1644_s6 + $0x4] ss:$8 sps:$4 sm:$0xff]  }
   0x8   :  { %113 = vperm.xlu0 %1105, %v33_v5   ;;  %v1159_v26 = vld [vmem:[%s1644_s6] ss:$8 sps:$4 sm:$0xff]   ;;  %v1160_v27 = vld [vmem:[%s1644_s6 + $0xd4] ss:$8 sps:$4 sm:$0xff]   ;;  %v1165_v28 = vld [vmem:[%s1644_s6 + $0xd0] ss:$8 sps:$4 sm:$0xff]  }
   0x9   :  { %86 = vmatpush1.bf16.msra.mxu0 %v1112_v7  ;;  %463 = vmatpush1.bf16.msra.mxu1 %v1123_v14  ;;  %v1166_v29 = vld [vmem:[%s1644_s6 + $0xc4] ss:$8 sps:$4 sm:$0xff]   ;;  %v1171_v30 = vld [vmem:[%s1644_s6 + $0xc0] ss:$8 sps:$4 sm:$0xff]   ;;  %v1172_v31 = vld [vmem:[%s1644_s6 + $0xb4] ss:$8 sps:$4 sm:$0xff]  }
   0xa   :  { %464 = vmatprep.subr.bf16.mxu1 %v1124_v15  ;;  %v1177_v32 = vld [vmem:[%s1644_s6 + $0xb0] ss:$8 sps:$4 sm:$0xff]  }
   0xc   :  { %979 = vmatmul.mubr.msk.bf16.vlgmr.msra.gmra.mxu0 %vm60_vm1, %v36_v9  ;;  %1107 = vset.pattern.permute.xlu0 %v1251_v10 }
   0xd   :  { %233 = vmatprep.mubr.bf16.mxu0 %v1249_v1  ;;  %465 = vmatpush1.bf16.msra.mxu1 %v1129_v16 }
   0xe   :  { %466 = vmatprep.subr.bf16.mxu1 %v1130_v17 }
  0x11   :  { %467 = vmatpush1.bf16.msra.mxu1 %v1135_v18  ;;  %v1252_v18 = vmov -1.0  }
  0x12   :  { %468 = vmatprep.subr.bf16.mxu1 %v1136_v19 }
  0x15   :  { %469 = vmatpush1.bf16.msra.mxu1 %v1141_v20 }
  0x16   :  { %470 = vmatprep.subr.bf16.mxu1 %v1142_v21 }
  0x19   :  { %471 = vmatpush1.bf16.msra.mxu1 %v1147_v22 }
  0x1a   :  { %472 = vmatprep.subr.bf16.mxu1 %v1148_v23 }
  0x1d   :  { %473 = vmatpush1.bf16.msra.mxu1 %v1153_v24 }
  0x1e   :  { %474 = vmatprep.subr.bf16.mxu1 %v1154_v25 }
  0x21   :  { %475 = vmatpush1.bf16.msra.mxu1 %v1159_v26 }
  0x22   :  { %480 = vmatprep.subr.bf16.mxu1 %v1160_v27 }
  0x25   :  { %481 = vmatpush2.bf16.msra.mxu1 %v1165_v28 }
  0x26   :  { %482 = vmatprep.subr.bf16.mxu1 %v1166_v29 }
  0x29   :  { %483 = vmatpush2.bf16.msra.mxu1 %v1171_v30 }
  0x2a   :  { %484 = vmatprep.subr.bf16.mxu1 %v1172_v31 }
  0x2d   :  { %485 = vmatpush2.bf16.msra.mxu1 %v1177_v32 }
  0x7e   :  { %v43_v33 = vpop.permute.xlu0 %42 }
  0x83   :  { %v114_v35 = vpop.permute.xlu0 %113 }
  0xcc   :  { %v105_v34 = vpop.f32.mrf.mxu0 }
  0xcd   :  { %v106_v36 = vadd.f32 %v105_v34, %v43_v33 }
  0xce   :  { %v107_v37 = vpop.f32.mrf.mxu0 }
  0xcf   :  { %v116_v38 = vmul.f32 %v114_v35, %v106_v36  ;;  %v108_v39 = vadd.f32 %v107_v37, %v43_v33  ;;  %v1122_v33 = vld [vmem:[%s1644_s6 + $0x154] ss:$8 sps:$4 sm:$0xff]   ;;  %v1120_v36 = vld [vmem:[%s1644_s6 + $0x150] ss:$8 sps:$4 sm:$0xff]   ;;  %v1128_v37 = vld [vmem:[%s1644_s6 + $0x144] ss:$8 sps:$4 sm:$0xff]  }
  0xd0   :  { %v109_v40 = vpop.f32.mrf.mxu0 }
  0xd1   :  { %v120_v41 = vmul.f32 0.70710677, %v116_v38  ;;  %v117_v42 = vmul.f32 %v114_v35, %v108_v39  ;;  %v118_v23 = vmul.f32 0.5, %v116_v38  ;;  %v1113_v35 = vld [vmem:[%s1643_s2] sm:$0xff]   ;;  %v1134_v39 = vld [vmem:[%s1644_s6 + $0x134] ss:$8 sps:$4 sm:$0xff]  }
  0xd2   :  { %v110_v43 = vpop.f32.mrf.mxu0  ;;  %v1126_v38 = vld [vmem:[%s1644_s6 + $0x140] ss:$8 sps:$4 sm:$0xff]  }
  0xd3   :  { %v126_v44 = vand.u32 2147483647, %v120_v41  ;;  %v121_v45 = vmul.f32 0.70710677, %v117_v42  ;;  %vm122_vm2 = vcmp.ge.f32.partialorder %v120_v41, 0.0  ;;  %v119_v28 = vmul.f32 0.5, %v117_v42 }
  0xd4   :  { %v124_v19 = vsel %vm122_vm2, 1.0, %v1252_v18  ;;  %v1114_v40 = vld [vmem:[%s1643_s2 + $0x8] sm:$0xff]   ;;  %v1132_v41 = vld [vmem:[%s1644_s6 + $0x130] ss:$8 sps:$4 sm:$0xff]   ;;  %v1146_v43 = vld [vmem:[%s1644_s6 + $0x114] ss:$8 sps:$4 sm:$0xff]  }
  0xd5   :  { %v128_v46 = vmul.f32 0.3275911, %v126_v44  ;;  %v127_v47 = vand.u32 2147483647, %v121_v45  ;;  %v154_v51 = vsub.f32 0.0, %v126_v44  ;;  %vm123_vm3 = vcmp.ge.f32.partialorder %v121_v45, 0.0 }
  0xd6   :  { %v125_v25 = vsel %vm123_vm3, 1.0, %v1252_v18  ;;  %v1138_v42 = vld [vmem:[%s1644_s6 + $0x120] ss:$8 sps:$4 sm:$0xff]   ;;  %v1152_v45 = vld [vmem:[%s1644_s6 + $0x104] ss:$8 sps:$4 sm:$0xff]  }
  0xd7   :  { %v130_v48 = vadd.f32 1.0, %v128_v46  ;;  %v129_v49 = vmul.f32 0.3275911, %v127_v47  ;;  %v155_v52 = vsub.f32 0.0, %v127_v47  ;;  %v156_v53 = vmul.f32 %v154_v51, %v126_v44  ;;  %v1144_v44 = vld [vmem:[%s1644_s6 + $0x110] ss:$8 sps:$4 sm:$0xff]  }
  0xd8   :  { %v1150_v46 = vld [vmem:[%s1644_s6 + $0x100] ss:$8 sps:$4 sm:$0xff]   ;;  %v1170_v51 = vld [vmem:[%s1644_s6 + $0x1b4] ss:$8 sps:$4 sm:$0xff]  }
  0xd9   :  { %1241 = vrcp.f32 %v130_v48  ;;  %v131_v50 = vadd.f32 1.0, %v129_v49  ;;  %v157_v55 = vmul.f32 %v155_v52, %v127_v47  ;;  %v158_v57 = vmul.f32 1.442695, %v156_v53  ;;  %v1158_v47 = vld [vmem:[%s1644_s6 + $0xf4] ss:$8 sps:$4 sm:$0xff]   ;;  %v261_v18 = vld [vmem:[%s1647_s5 + $0x8] sm:$0xff] }
  0xda   :  { %v1156_v48 = vld [vmem:[%s1644_s6 + $0xf0] ss:$8 sps:$4 sm:$0xff]   ;;  %v1164_v49 = vld [vmem:[%s1644_s6 + $0xe4] ss:$8 sps:$4 sm:$0xff]  }
  0xdb   :  { %1243 = vrcp.f32 %v131_v50  ;;  %v160_v61 = vmul.f32 1.442695, %v157_v55  ;;  %v1162_v50 = vld [vmem:[%s1644_s6 + $0xe0] ss:$8 sps:$4 sm:$0xff]   ;;  %v1168_v52 = vld [vmem:[%s1644_s6 + $0x1b0] ss:$8 sps:$4 sm:$0xff]  }
  0xdc   :  { %1245 = vpow2.f32 %v158_v57  ;;  %v1176_v53 = vld [vmem:[%s1644_s6 + $0x1a4] ss:$8 sps:$4 sm:$0xff]   ;;  %v1180_v57 = vld [vmem:[%s1644_s6 + $0x190] ss:$8 sps:$4 sm:$0xff]  }
  0xdd   :  { %1247 = vpow2.f32 %v160_v61  ;;  %v1178_v55 = vld [vmem:[%s1644_s6 + $0xa4] ss:$8 sps:$4 sm:$0xff]   ;;  %v1186_v61 = vld [vmem:[%s1644_s6 + $0x180] ss:$8 sps:$4 sm:$0xff]  }
  0xde   :  { %486 = vmatprep.subr.bf16.mxu1 %v1178_v55  ;;  %v1226_v55 = vld [vmem:[%s1645_s7 + $0xc0] ss:$8 sps:$4 sm:$0xff]  }
  0xe6   :  { %v1242_v54 = vpop.eup %1241 }
  0xe7   :  { %v136_v56 = vmul.f32 1.0614054, %v1242_v54 }
  0xe8   :  { %v1244_v58 = vpop.eup %1243 }
  0xe9   :  { %v138_v59 = vadd.f32 -1.4531521, %v136_v56  ;;  %v137_v60 = vmul.f32 1.0614054, %v1244_v58  ;;  %v1246_v12 = vpop.eup %1245  ;;  %v1182_v56 = vld [vmem:[%s1644_s6 + $0x194] ss:$8 sps:$4 sm:$0xff]  }
  0xea   :  { %v1248_v16 = vpop.eup %1247 }
  0xeb   :  { %v140_v62 = vmul.f32 %v1242_v54, %v138_v59  ;;  %v139_v63 = vadd.f32 -1.4531521, %v137_v60  ;;  %v1184_v59 = vld [vmem:[%s1644_s6 + $0x94] ss:$8 sps:$4 sm:$0xff]   ;;  %v1188_v60 = vld [vmem:[%s1644_s6 + $0x184] ss:$8 sps:$4 sm:$0xff]  }
  0xed   :  { %v142_v0 = vadd.f32 1.4214138, %v140_v62  ;;  %v141_v2 = vmul.f32 %v1244_v58, %v139_v63  ;;  %v1189_v62 = vld [vmem:[%s1644_s6 + $0x90] ss:$8 sps:$4 sm:$0xff]   ;;  %v1190_v63 = vld [vmem:[%s1644_s6 + $0x84] ss:$8 sps:$4 sm:$0xff]  }
  0xef   :  { %v144_v3 = vmul.f32 %v1242_v54, %v142_v0  ;;  %v143_v4 = vadd.f32 1.4214138, %v141_v2  ;;  %v1194_v0 = vld [vmem:[%s1644_s6 + $0x174] ss:$8 sps:$4 sm:$0xff]   ;;  %v1192_v2 = vld [vmem:[%s1644_s6 + $0x170] ss:$8 sps:$4 sm:$0xff]  }
  0xf1   :  { %v146_v5 = vadd.f32 -0.28449672, %v144_v3  ;;  %v145_v6 = vmul.f32 %v1244_v58, %v143_v4  ;;  %v1195_v3 = vld [vmem:[%s1644_s6 + $0x80] ss:$8 sps:$4 sm:$0xff]   ;;  %v1198_v4 = vld [vmem:[%s1644_s6 + $0x164] ss:$8 sps:$4 sm:$0xff]  }
  0xf3   :  { %v148_v7 = vmul.f32 %v1242_v54, %v146_v5  ;;  %v147_v8 = vadd.f32 -0.28449672, %v145_v6  ;;  %v1196_v5 = vld [vmem:[%s1644_s6 + $0x160] ss:$8 sps:$4 sm:$0xff]   ;;  %v1201_v6 = vld [vmem:[%s1645_s7 + $0x74] ss:$8 sps:$4 sm:$0xff]  }
  0xf5   :  { %v150_v9 = vadd.f32 0.2548296, %v148_v7  ;;  %v149_v10 = vmul.f32 %v1244_v58, %v147_v8  ;;  %v264_v7 = vlaneseq }
  0xf7   :  { %v152_v11 = vmul.f32 %v1242_v54, %v150_v9  ;;  %v151_v13 = vadd.f32 0.2548296, %v149_v10  ;;  %v1174_v54 = vld [vmem:[%s1644_s6 + $0x1a0] ss:$8 sps:$4 sm:$0xff]   ;;  %v1503_v8 = vshrl.u32 %v264_v7, 7  ;;  %v256_v10 = vpop.permute.xlu1 %255 }
  0xf9   :  { %v162_v14 = vmul.f32 %v1246_v12, %v152_v11  ;;  %v153_v15 = vmul.f32 %v1244_v58, %v151_v13  ;;  %v1183_v58 = vld [vmem:[%s1644_s6 + $0xa0] ss:$8 sps:$4 sm:$0xff]   ;;  %v278_v9 = vsub.s32 0, %v1503_v8 }
  0xfa   :  { %487 = vmatpush2.bf16.msra.mxu1 %v1183_v58  ;;  %v1509_v11 = vld [vmem:[%s1646_s4] sm:$0x1f] }
  0xfb   :  { %v164_v17 = vsub.f32 1.0, %v162_v14  ;;  %v163_v20 = vmul.f32 %v1248_v16, %v153_v15  ;;  %488 = vmatprep.subr.bf16.mxu1 %v1184_v59  ;;  %v260_v13 = vld [vmem:[%s1647_s5] sm:$0xff]  ;;  %v1517_v14 = vld [vmem:[%s1646_s4 + $0x8] sm:$0x1f] }
  0xfc   :  { %v1234_v58 = vld [vmem:[%s1645_s7 + $0xa4] ss:$8 sps:$4 sm:$0xff]   ;;  %v1232_v59 = vld [vmem:[%s1645_s7 + $0xa0] ss:$8 sps:$4 sm:$0xff]  }
  0xfd   :  { %v166_v21 = vmul.f32 %v164_v17, %v124_v19  ;;  %v165_v22 = vsub.f32 1.0, %v163_v20  ;;  %v279_v17 = vrot.slane %v1509_v11, %v278_v9  ;;  %v505_v19 = vsub.s32 1, %v1503_v8 }
  0xfe   :  { %489 = vmatpush2.bf16.msra.mxu1 %v1189_v62  ;;  %v1240_v62 = vld [vmem:[%s1645_s7 + $0x84] ss:$8 sps:$4 sm:$0xff]  }
  0xff   :  { %v168_v24 = vadd.f32 1.0, %v166_v21  ;;  %v167_v26 = vmul.f32 %v165_v22, %v125_v25  ;;  %490 = vmatprep.subr.bf16.mxu1 %v1190_v63  ;;  %v283_v22 = vrot.slane %v1517_v14, %v278_v9  ;;  %v1238_v63 = vld [vmem:[%s1645_s7 + $0x80] ss:$8 sps:$4 sm:$0xff]  }
 0x101   :  { %v170_v27 = vmul.f32 %v168_v24, %v118_v23  ;;  %v169_v29 = vadd.f32 1.0, %v167_v26 }
 0x102   :  { %491 = vmatpush2.bf16.msra.mxu1 %v1195_v3 }
 0x103   :  { %v172_v30 = vpack.c.bf16 %v170_v27, %v170_v27  ;;  %v171_v31 = vmul.f32 %v169_v29, %v119_v28  ;;  %915 = vmatprep.subr.bf16.mxu1 %v1201_v6  ;;  %v506_v27 = vrot.slane %v1509_v11, %v505_v19  ;;  %v510_v29 = vrot.slane %v1517_v14, %v505_v19 }
 0x105   :  { %v173_v32 = vpack.c.bf16 %v171_v31, %v171_v31  ;;  %v196_v34 = vsel %vm64_vm0, %v172_v30, 0 }
 0x107   :  { %982 = vmatprep.subr.msk.bf16.mxu0 %vm64_vm0, %v173_v32  ;;  %v1199_v32 = vld [vmem:[%s1645_s7 + $0x70] ss:$8 sps:$4 sm:$0xff]  }
 0x108   :  { %216 = vmatpush1.bf16.msra.mxu0 %v196_v34 }
 0x109   :  { %687 = vmatprep.subr.bf16.mxu0 %v1122_v33 }
 0x10b   :  { %983 = vmatmul.mubr.msk.bf16.vlgmr.msra.gmra.mxu0 %vm188_vm4, %v1113_v35 }
 0x10c   :  { %243 = vmatprep.mubr.bf16.mxu0 %v1249_v1  ;;  %688 = vmatpush1.bf16.msra.mxu0 %v1120_v36  ;;  %v1140_v1 = vld [vmem:[%s1644_s6 + $0x124] ss:$8 sps:$4 sm:$0xff]  }
 0x10d   :  { %689 = vmatprep.subr.bf16.mxu0 %v1128_v37  ;;  %v1204_v36 = vld [vmem:[%s1645_s7 + $0x64] ss:$8 sps:$4 sm:$0xff]  }
 0x110   :  { %690 = vmatpush1.bf16.msra.mxu0 %v1126_v38 }
 0x111   :  { %691 = vmatprep.subr.bf16.mxu0 %v1134_v39  ;;  %v1202_v39 = vld [vmem:[%s1645_s7 + $0x60] ss:$8 sps:$4 sm:$0xff]  }
 0x113   :  { %984 = vmatmul.mubr.msk.bf16.gmra.mxu0 %vm188_vm4, %v1114_v40 }
 0x114   :  { %692 = vmatpush1.bf16.msra.mxu0 %v1132_v41  ;;  %v1207_v41 = vld [vmem:[%s1645_s7 + $0x54] ss:$8 sps:$4 sm:$0xff]  }
 0x115   :  { %693 = vmatprep.subr.bf16.mxu0 %v1140_v1  ;;  %v1205_v1 = vld [vmem:[%s1645_s7 + $0x50] ss:$8 sps:$4 sm:$0xff]  }
 0x118   :  { %694 = vmatpush1.bf16.msra.mxu0 %v1138_v42  ;;  %v1210_v42 = vld [vmem:[%s1645_s7 + $0x44] ss:$8 sps:$4 sm:$0xff]  }
 0x119   :  { %695 = vmatprep.subr.bf16.mxu0 %v1146_v43  ;;  %v1208_v43 = vld [vmem:[%s1645_s7 + $0x40] ss:$8 sps:$4 sm:$0xff]  }
 0x11c   :  { %696 = vmatpush1.bf16.msra.mxu0 %v1144_v44  ;;  %v1213_v44 = vld [vmem:[%s1645_s7 + $0x34] ss:$8 sps:$4 sm:$0xff]  }
 0x11d   :  { %697 = vmatprep.subr.bf16.mxu0 %v1152_v45  ;;  %v1211_v45 = vld [vmem:[%s1645_s7 + $0x30] ss:$8 sps:$4 sm:$0xff]  }
 0x120   :  { %698 = vmatpush1.bf16.msra.mxu0 %v1150_v46  ;;  %v1216_v46 = vld [vmem:[%s1645_s7 + $0x24] ss:$8 sps:$4 sm:$0xff]  }
 0x121   :  { %699 = vmatprep.subr.bf16.mxu0 %v1158_v47  ;;  %v1214_v47 = vld [vmem:[%s1645_s7 + $0x20] ss:$8 sps:$4 sm:$0xff]  }
 0x124   :  { %700 = vmatpush1.bf16.msra.mxu0 %v1156_v48  ;;  %v1219_v48 = vld [vmem:[%s1645_s7 + $0x14] ss:$8 sps:$4 sm:$0xff]  }
 0x125   :  { %701 = vmatprep.subr.bf16.mxu0 %v1164_v49  ;;  %v1217_v49 = vld [vmem:[%s1645_s7 + $0x10] ss:$8 sps:$4 sm:$0xff]  }
 0x128   :  { %702 = vmatpush1.bf16.msra.mxu0 %v1162_v50  ;;  %v1222_v50 = vld [vmem:[%s1645_s7 + $0x4] ss:$8 sps:$4 sm:$0xff]  }
 0x129   :  { %707 = vmatprep.subr.bf16.mxu0 %v1170_v51  ;;  %v1220_v51 = vld [vmem:[%s1645_s7] ss:$8 sps:$4 sm:$0xff]  }
 0x12c   :  { %708 = vmatpush2.bf16.msra.mxu0 %v1168_v52  ;;  %v1225_v52 = vld [vmem:[%s1645_s7 + $0xd4] ss:$8 sps:$4 sm:$0xff]  }
 0x12d   :  { %709 = vmatprep.subr.bf16.mxu0 %v1176_v53  ;;  %v1223_v53 = vld [vmem:[%s1645_s7 + $0xd0] ss:$8 sps:$4 sm:$0xff]  }
 0x130   :  { %710 = vmatpush2.bf16.msra.mxu0 %v1174_v54  ;;  %v1228_v54 = vld [vmem:[%s1645_s7 + $0xc4] ss:$8 sps:$4 sm:$0xff]  }
 0x131   :  { %711 = vmatprep.subr.bf16.mxu0 %v1182_v56  ;;  %v1231_v56 = vld [vmem:[%s1645_s7 + $0xb4] ss:$8 sps:$4 sm:$0xff]  }
 0x134   :  { %712 = vmatpush2.bf16.msra.mxu0 %v1180_v57  ;;  %v1229_v57 = vld [vmem:[%s1645_s7 + $0xb0] ss:$8 sps:$4 sm:$0xff]  }
 0x135   :  { %713 = vmatprep.subr.bf16.mxu0 %v1188_v60  ;;  %v1237_v60 = vld [vmem:[%s1645_s7 + $0x94] ss:$8 sps:$4 sm:$0xff]  }
 0x138   :  { %714 = vmatpush2.bf16.msra.mxu0 %v1186_v61  ;;  %v1235_v61 = vld [vmem:[%s1645_s7 + $0x90] ss:$8 sps:$4 sm:$0xff]  }
 0x139   :  { %715 = vmatprep.subr.bf16.mxu0 %v1194_v0  ;;  %v266_v0 = vsub.s32 2, %v1503_v8 }
 0x13b   :  { %v267_v3 = vrot.slane %v1509_v11, %v266_v0 }
 0x13c   :  { %716 = vmatpush2.bf16.msra.mxu0 %v1192_v2 }
 0x13d   :  { %717 = vmatprep.subr.bf16.mxu0 %v1198_v4  ;;  %v271_v4 = vrot.slane %v1517_v14, %v266_v0 }
 0x140   :  { %718 = vmatpush2.bf16.msra.mxu0 %v1196_v5 }
 0x1cb   :  { %v235_v12 = vpop.f32.mrf.mxu0 }
 0x1cc   :  { %v258_v15 = vadd.f32 %v256_v10, %v235_v12 }
 0x1cd   :  { %v237_v16 = vpop.f32.mrf.mxu0 }
 0x1ce   :  { %v259_v20 = vadd.f32 %v256_v10, %v237_v16  ;;  %v262_v21 = vadd.f32 %v260_v13, %v258_v15 }
 0x1cf   :  { %v239_v23 = vpop.f32.mrf.mxu0 }
 0x1d0   :  { %v263_v24 = vadd.f32 %v261_v18, %v259_v20  ;;  %968 = vst [vmem:[%s1648_s9 + $0x10] sm:$0xff] %v262_v21  ;;  %v284_v25 = vmul.f32 %v279_v17, %v239_v23 }
 0x1d1   :  { %v241_v26 = vpop.f32.mrf.mxu0 }
 0x1d2   :  { %v285_v28 = vmul.f32 %v283_v22, %v241_v26  ;;  %969 = vst.msk [vmem:[%s1648_s9 + $0x18] sm:$0xff] %vm456_vm5, %v263_v24  ;;  %v286_v33 = vpack.c.bf16 %v284_v25, %v284_v25 }
 0x1d3   :  { %v245_v30 = vpop.f32.mrf.mxu0 }
 0x1d4   :  { %v287_v31 = vpack.c.bf16 %v285_v28, %v285_v28  ;;  %v511_v34 = vmul.f32 %v506_v27, %v245_v30  ;;  %v764_v27 = vsub.s32 3, %v1503_v8  ;;  %v958_v30 = vsub.s32 4, %v1503_v8 }
 0x1d5   :  { %v247_v35 = vpop.f32.mrf.mxu0 }
 0x1d6   :  { %v512_v37 = vmul.f32 %v510_v29, %v247_v35  ;;  %1013 = vmatprep.mubr.msk.bf16.mxu1 %vm456_vm5, %v287_v31  ;;  %v513_v40 = vpack.c.bf16 %v511_v34, %v511_v34  ;;  %v765_v28 = vrot.slane %v1509_v11, %v764_v27  ;;  %v760_v29 = vld [vmem:[%s1649_s8] sm:$0xff]  ;;  %v769_v31 = vrot.slane %v1517_v14, %v764_v27 }
 0x1d7   :  { %493 = vmatmul.mubr.bf16.vlgmr.msra.gmra.mxu1 %v286_v33  ;;  %v249_v2 = vpop.f32.mrf.mxu0  ;;  %v959_v34 = vrot.slane %v1509_v11, %v958_v30 }
 0x1d8   :  { %v514_v38 = vpack.c.bf16 %v512_v37, %v512_v37  ;;  %916 = vmatpush1.bf16.msra.mxu1 %v1199_v32  ;;  %v272_v6 = vmul.f32 %v267_v3, %v249_v2  ;;  %v761_v32 = vld [vmem:[%s1649_s8 + $0x8] sm:$0xff]  ;;  %v770_v33 = vmul.f32 %v765_v28, %v760_v29 }
 0x1d9   :  { %917 = vmatprep.subr.bf16.mxu1 %v1204_v36  ;;  %v251_v5 = vpop.f32.mrf.mxu0  ;;  %v771_v35 = vmul.f32 %v769_v31, %v761_v32 }
 0x1da   :  { %1070 = vmatprep.mubr.msk.bf16.mxu0 %vm456_vm5, %v514_v38  ;;  %v273_v7 = vmul.f32 %v271_v4, %v251_v5  ;;  %v274_v10 = vmul.f32 2.0, %v272_v6  ;;  %v963_v38 = vrot.slane %v1517_v14, %v958_v30 }
 0x1db   :  { %720 = vmatmul.mubr.bf16.vlgmr.msra.gmra.mxu0 %v513_v40 }
 0x1dc   :  { %918 = vmatpush1.bf16.msra.mxu1 %v1202_v39  ;;  %v275_v13 = vmul.f32 2.0, %v273_v7 }
 0x1dd   :  { %919 = vmatprep.subr.bf16.mxu1 %v1207_v41 }
 0x1e0   :  { %920 = vmatpush1.bf16.msra.mxu1 %v1205_v1 }
 0x1e1   :  { %921 = vmatprep.subr.bf16.mxu1 %v1210_v42 }
 0x1e4   :  { %922 = vmatpush1.bf16.msra.mxu1 %v1208_v43 }
 0x1e5   :  { %923 = vmatprep.subr.bf16.mxu1 %v1213_v44 }
 0x1e8   :  { %924 = vmatpush1.bf16.msra.mxu1 %v1211_v45 }
 0x1e9   :  { %925 = vmatprep.subr.bf16.mxu1 %v1216_v46 }
 0x1ec   :  { %926 = vmatpush1.bf16.msra.mxu1 %v1214_v47 }
 0x1ed   :  { %927 = vmatprep.subr.bf16.mxu1 %v1219_v48 }
 0x1f0   :  { %928 = vmatpush1.bf16.msra.mxu1 %v1217_v49 }
 0x1f1   :  { %929 = vmatprep.subr.bf16.mxu1 %v1222_v50 }
 0x1f4   :  { %930 = vmatpush1.bf16.msra.mxu1 %v1220_v51 }
 0x1f5   :  { %935 = vmatprep.subr.bf16.mxu1 %v1225_v52 }
 0x1f8   :  { %936 = vmatpush2.bf16.msra.mxu1 %v1223_v53 }
 0x1f9   :  { %937 = vmatprep.subr.bf16.mxu1 %v1228_v54 }
 0x1fc   :  { %938 = vmatpush2.bf16.msra.mxu1 %v1226_v55 }
 0x1fd   :  { %939 = vmatprep.subr.bf16.mxu1 %v1231_v56 }
 0x200   :  { %940 = vmatpush2.bf16.msra.mxu1 %v1229_v57 }
 0x201   :  { %941 = vmatprep.subr.bf16.mxu1 %v1234_v58 }
 0x204   :  { %942 = vmatpush2.bf16.msra.mxu1 %v1232_v59 }
 0x205   :  { %943 = vmatprep.subr.bf16.mxu1 %v1237_v60 }
 0x208   :  { %944 = vmatpush2.bf16.msra.mxu1 %v1235_v61 }
 0x209   :  { %945 = vmatprep.subr.bf16.mxu1 %v1240_v62 }
 0x20c   :  { %946 = vmatpush2.bf16.msra.mxu1 %v1238_v63 }
 0x297   :  { %v494_v9 = vpop.f32.mrf.mxu1 }
 0x298   :  { %v501_v15 = vadd.f32 %v494_v9, %v274_v10 }
 0x299   :  { %v496_v12 = vpop.f32.mrf.mxu1 }
 0x29a   :  { %v502_v18 = vadd.f32 %v496_v12, %v275_v13 }
 0x29b   :  { %v498_v16 = vpop.f32.mrf.mxu1  ;;  %v721_v17 = vpop.f32.mrf.mxu0 }
 0x29c   :  { %v728_v19 = vadd.f32 %v721_v17, %v501_v15 }
 0x29d   :  { %v499_v20 = vpop.f32.mrf.mxu1  ;;  %v723_v21 = vpop.f32.mrf.mxu0 }
 0x29e   :  { %v729_v22 = vadd.f32 %v723_v21, %v502_v18  ;;  %v730_v25 = vpack.c.bf16 %v728_v19, %v728_v19 }
 0x29f   :  { %v725_v23 = vpop.f32.mrf.mxu0 }
 0x2a0   :  { %v731_v24 = vpack.c.bf16 %v729_v22, %v729_v22 }
 0x2a1   :  { %v726_v26 = vpop.f32.mrf.mxu0 }
 0x2a2   :  { %1099 = vmatprep.mubr.msk.bf16.mxu1 %vm456_vm5, %v731_v24 }
 0x2a3   :  { %948 = vmatmul.mubr.bf16.vlgmr.msra.gmra.mxu1 %v730_v25 }
 0x363   :  { %v949_v36 = vpop.f32.mrf.mxu1 }
 0x364   :  { %v950_v37 = vadd.f32 %v949_v36, %v770_v33 }
 0x365   :  { %v951_v39 = vpop.f32.mrf.mxu1 }
 0x366   :  { %v964_v40 = vadd.f32 %v959_v34, %v950_v37  ;;  %v952_v41 = vadd.f32 %v951_v39, %v771_v35 }
 0x367   :  { %v953_v1 = vpop.f32.mrf.mxu1 }
 0x368   :  { %966 = vst [vmem:[%s1648_s9] sm:$0xff] %v964_v40  ;;  %v965_v8 = vadd.f32 %v963_v38, %v952_v41 }
 0x369   :  { %v954_v42 = vpop.f32.mrf.mxu1 }
 0x36a   :  { %967 = vst.msk [vmem:[%s1648_s9 + $0x8] sm:$0xff] %vm456_vm5, %v965_v8 }

</bundles_post_ra>
